<compile_context>
chip_gen: v6e
topology: v6e:2x2x1
jax: 0.10.0
libtpu: 0.0.40
codegen_flags: <defaults>
</compile_context>

<pallas_src>
import jax
import jax.numpy as jnp
from jax.experimental import pallas as pl
from jax.experimental.pallas import tpu as pltpu

INPUT_DIM = 10


def logistic_regression_kernel(x_ref, w_ref, b_ref, o_ref):
    """One batch tile of sigmoid(x @ W.T + b).

    x_ref: (tm, D) VMEM (native input dtype) -- batch on sublanes, features on lanes
    w_ref: (1, D)  f32 VMEM                  -- resident across all grid steps
    b_ref: (1,)    f32 SMEM                  -- scalar bias
    o_ref: (1, tm) f32 VMEM                  -- lane-dense output (batch on lanes)
    """
    # Upcast in-kernel (hidden under the HBM DMA); avoids a separate XLA cast pass.
    x = x_ref[...].astype(jnp.float32)
    # Contract the feature dim of both operands ("NT" matmul):
    #   (1, D) . (tm, D)^T -> (1, tm)
    # Per-row logits land directly on the lane axis, so the output store is a dense,
    # unmasked vst and no relayout of the result is needed.
    z = jax.lax.dot_general(
        w_ref[...],
        x,
        dimension_numbers=(((1,), (1,)), ((), ())),
        preferred_element_type=jnp.float32,
    )
    z = z + b_ref[0]  # scalar bias from SMEM
    # Exact sigmoid: exp runs on the EUP, the divide on the VPU -- both are fully
    # hidden under the DMA of the next x tile. For very negative z, exp(-z) -> inf
    # and 1/inf -> 0, the correct limit (no NaN path).
    o_ref[...] = (1.0 / (1.0 + jnp.exp(-z))).astype(o_ref.dtype)


def _round_up(n, m):
    return ((n + m - 1) // m) * m


def logistic_regression_forward(x, weight, bias, *, block_rows=32768):
    """sigmoid(x @ weight.T + bias).

    x: (B, D) (any float dtype), weight: (1, D), bias: (1,)  [PyTorch nn.Linear layout].
    Returns (B, 1) f32, matching the PyTorch module's output.
    """
    weight = weight.astype(jnp.float32)
    bias = bias.astype(jnp.float32).reshape(1)

    B, D = x.shape
    assert weight.shape == (1, D), "weight must be (1, input_dim)"

    # Tile selection:
    #   * small B: single full-array block (always legal); per-step overhead would
    #     dominate a multi-tile run.
    #   * larger B: at least 2 grid steps (v7x megacore sharding), capped at
    #     block_rows rows per tile; tm must be a multiple of 128 for the lane-dense
    #     (1, tm) output tile (and a multiple of 8 for the (tm, D) x tile).
    if B <= 2048:
        tm = B
    else:
        tm = min(block_rows, _round_up(pl.cdiv(B, 2), 128))
        assert tm % 128 == 0
    grid = (pl.cdiv(B, tm),)

    x_bytes = B * D * x.dtype.itemsize
    cost = pl.CostEstimate(
        flops=2 * B * D,
        transcendentals=B,
        bytes_accessed=x_bytes + D * 4 + 4 + B * 4,
    )

    out_lane = pl.pallas_call(
        logistic_regression_kernel,
        out_shape=jax.ShapeDtypeStruct((1, B), jnp.float32),
        grid=grid,
        in_specs=[
            pl.BlockSpec((tm, D), lambda i: (i, 0)),             # x: batch-tiled, pipelined
            pl.BlockSpec((1, D), lambda i: (0, 0)),              # weight: resident in VMEM
            pl.BlockSpec(memory_space=pltpu.MemorySpace.SMEM),   # bias: scalar in SMEM
        ],
        out_specs=pl.BlockSpec((1, tm), lambda i: (0, i)),       # lane-dense output tile
        compiler_params=pltpu.CompilerParams(
            dimension_semantics=("parallel",),   # batch tiles shard across TensorCores
            # 2 x 16 MiB double-buffered x tiles (+ small out/weight buffers) at
            # tm=32768; 48 MiB limit leaves headroom under v7x's 64 MiB VMEM and is
            # comfortably inside v5e/v6e's 128 MiB.
            vmem_limit_bytes=48 * 1024 * 1024,
        ),
        cost_estimate=cost,
    )(x, weight, bias)

    return out_lane.reshape(B, 1)


if __name__ == "__main__":
    key = jax.random.PRNGKey(0)
    kx, kw, kb = jax.random.split(key, 3)

    B = 512
    x = jax.random.normal(kx, (B, INPUT_DIM), dtype=jnp.float32)

    # Deterministic parameter init (uniform in +-1/sqrt(fan_in), like nn.Linear).
    bound = 1.0 / (INPUT_DIM ** 0.5)
    weight = jax.random.uniform(kw, (1, INPUT_DIM), jnp.float32, -bound, bound)
    bias = jax.random.uniform(kb, (1,), jnp.float32, -bound, bound)

    # Small B -> single-tile grid (per review: don't force multi-tile runs here).
    out = logistic_regression_forward(x, weight, bias)
    out = jax.block_until_ready(out)

    # Reference check in plain JAX (exact sigmoid in the kernel -> tight tolerance).
    ref = jax.nn.sigmoid(x @ weight.T + bias)
    assert out.shape == (B, 1)
    assert jnp.allclose(out, ref, atol=1e-6), "mismatch vs reference"

    print("KERNEL_OK")
</pallas_src>

<mosaic_0001>
module attributes {stable_mosaic.version = 11 : i64} {
  func.func @logistic_regression_kernel(%arg0: i32, %arg1: memref<512x10xf32, #tpu.memory_space<vmem>>, %arg2: memref<1x10xf32, #tpu.memory_space<vmem>>, %arg3: memref<1xf32, #tpu.memory_space<smem>>, %arg4: memref<1x512xf32, #tpu.memory_space<vmem>>) attributes {dimension_semantics = [#tpu.dimension_semantics<parallel>], iteration_bounds = array<i64: 1>, scalar_prefetch = 0 : i64, scratch_operands = 0 : i64, tpu.core_type = #tpu.core_type<tc>, window_params = [{transform_indices = @transform_0, window_bounds = array<i64: 512, 10>}, {pipeline_mode = #tpu.pipeline_mode<synchronous>, transform_indices = @transform_1, window_bounds = array<i64: 1, 10>}, {transform_indices = @transform_2, window_bounds = array<i64: 1>}, {transform_indices = @transform_3, window_bounds = array<i64: 1, 512>}]} {
    %c0 = arith.constant 0 : index
    %c0_0 = arith.constant 0 : index
    %0 = vector.load %arg1[%c0, %c0_0] : memref<512x10xf32, #tpu.memory_space<vmem>>, vector<512x10xf32>
    %c0_1 = arith.constant 0 : index
    %c0_2 = arith.constant 0 : index
    %1 = vector.load %arg2[%c0_1, %c0_2] : memref<1x10xf32, #tpu.memory_space<vmem>>, vector<1x10xf32>
    %cst = arith.constant dense<0.000000e+00> : vector<1x512xf32>
    %2 = tpu.matmul %1, %0, %cst {dimension_numbers = #tpu.dot_dimension_numbers<[1], [1], [0], [0], [0, 0, 1, 0], [], []>} : vector<1x10xf32>, vector<512x10xf32>, vector<1x512xf32> -> vector<1x512xf32>
    %c0_3 = arith.constant 0 : index
    %3 = memref.load %arg3[%c0_3] : memref<1xf32, #tpu.memory_space<smem>>
    %4 = vector.broadcast %3 : f32 to vector<1x512xf32>
    %5 = arith.addf %2, %4 : vector<1x512xf32>
    %cst_4 = arith.constant 0.000000e+00 : f32
    %6 = vector.broadcast %cst_4 : f32 to vector<1x512xf32>
    %7 = arith.subf %6, %5 : vector<1x512xf32>
    %8 = math.exp %7 : vector<1x512xf32>
    %cst_5 = arith.constant 1.000000e+00 : f32
    %9 = vector.broadcast %cst_5 : f32 to vector<1x512xf32>
    %10 = arith.addf %9, %8 : vector<1x512xf32>
    %cst_6 = arith.constant 1.000000e+00 : f32
    %11 = vector.broadcast %cst_6 : f32 to vector<1x512xf32>
    %12 = arith.divf %11, %10 : vector<1x512xf32>
    %c0_7 = arith.constant 0 : index
    %c0_8 = arith.constant 0 : index
    %13 = vector.load %arg4[%c0_7, %c0_8] : memref<1x512xf32, #tpu.memory_space<vmem>>, vector<1x512xf32>
    tpu.vector_store %arg4[%c0_7, %c0_8], %12 {strides = array<i32>} : memref<1x512xf32, #tpu.memory_space<vmem>>, vector<1x512xf32>,
    return
  }
  func.func @transform_0(%arg0: i32) -> (i32, i32) {
    %c0_i32 = arith.constant 0 : i32
    %c0_i32_0 = arith.constant 0 : i32
    return %arg0, %c0_i32 : i32, i32
  }
  func.func @transform_1(%arg0: i32) -> (i32, i32) {
    %c0_i32 = arith.constant 0 : i32
    %c0_i32_0 = arith.constant 0 : i32
    %c0_i32_1 = arith.constant 0 : i32
    return %c0_i32, %c0_i32_0 : i32, i32
  }
  func.func @transform_2(%arg0: i32) -> i32 {
    %c0_i32 = arith.constant 0 : i32
    %c0_i32_0 = arith.constant 0 : i32
    return %c0_i32 : i32
  }
  func.func @transform_3(%arg0: i32) -> (i32, i32) {
    %c0_i32 = arith.constant 0 : i32
    %c0_i32_0 = arith.constant 0 : i32
    return %c0_i32, %arg0 : i32, i32
  }
}

</mosaic_0001>

<bundles_post_ra>
// kernel: tpu_custom_call.1
= control target key start
LH: loop header
LB: loop body
LE: loop exit
PB: predicated region body
PF: predicated region fallthrough
CT: control target
= control target key end

     0   :  { %vm83_vm0 = vcmask 80896   ;;  %s964_s0 = inlined_call_operand.vmem [shape: f32[512,10], index: 0, kind: input, shape index: {}]   ;;  %s965_s1 = inlined_call_operand.vmem [shape: f32[1,10], index: 1, kind: input, shape index: {}]   ;;  %s966_s2 = inlined_call_operand.<no memory space> [shape: f32[1], index: 2, kind: input, shape index: {}]   ;;  %s967_s3 = inlined_call_operand.hbm [shape: f32[1,512], index: 3, kind: output, shape index: {}]  }
   0x1   :  { %v47_v0 = vld [vmem:[%s964_s0 + $0xf8] sm:$0xff]  ;;  %v46_v4 = vld [vmem:[%s964_s0 + $0xf0] sm:$0xff]  ;;  %v45_v8 = vld [vmem:[%s964_s0 + $0xe8] sm:$0xff] }
   0x2   :  { %v79_v1 = vld [vmem:[%s964_s0 + $0x1f8] sm:$0xff]  ;;  %559 = vmatprep.subr.msk.mxu0 %vm83_vm0, %v47_v0  ;;  %v78_v5 = vld [vmem:[%s964_s0 + $0x1f0] sm:$0xff]  ;;  %v77_v9 = vld [vmem:[%s964_s0 + $0x1e8] sm:$0xff] }
   0x3   :  { %v31_v2 = vld [vmem:[%s964_s0 + $0x78] sm:$0xff]  ;;  %593 = vmatprep.subr.msk.mxu1 %vm83_vm0, %v79_v1  ;;  %v30_v6 = vld [vmem:[%s964_s0 + $0x70] sm:$0xff]  ;;  %v29_v10 = vld [vmem:[%s964_s0 + $0x68] sm:$0xff] }
   0x4   :  { %v63_v3 = vld [vmem:[%s964_s0 + $0x178] sm:$0xff]  ;;  %560 = vmatpush3.xpose.msk.msra.mxu0 %vm83_vm0, %v31_v2  ;;  %v62_v7 = vld [vmem:[%s964_s0 + $0x170] sm:$0xff]  ;;  %v61_v11 = vld [vmem:[%s964_s0 + $0x168] sm:$0xff] }
   0x5   :  { %594 = vmatpush3.xpose.msk.msra.mxu1 %vm83_vm0, %v63_v3  ;;  %561 = vmatprep.subr.msk.mxu0 %vm83_vm0, %v46_v4  ;;  %v44_v12 = vld [vmem:[%s964_s0 + $0xe0] sm:$0xff]  ;;  %v43_v16 = vld [vmem:[%s964_s0 + $0xd8] sm:$0xff]  ;;  %v42_v20 = vld [vmem:[%s964_s0 + $0xd0] sm:$0xff] }
   0x6   :  { %595 = vmatprep.subr.msk.mxu1 %vm83_vm0, %v78_v5  ;;  %v76_v13 = vld [vmem:[%s964_s0 + $0x1e0] sm:$0xff]  ;;  %v75_v17 = vld [vmem:[%s964_s0 + $0x1d8] sm:$0xff]  ;;  %v74_v21 = vld [vmem:[%s964_s0 + $0x1d0] sm:$0xff] }
   0x7   :  { %v28_v14 = vld [vmem:[%s964_s0 + $0x60] sm:$0xff]  ;;  %v27_v18 = vld [vmem:[%s964_s0 + $0x58] sm:$0xff]  ;;  %v26_v22 = vld [vmem:[%s964_s0 + $0x50] sm:$0xff] }
   0x8   :  { %562 = vmatpush3.xpose.msk.msra.mxu0 %vm83_vm0, %v30_v6  ;;  %v60_v15 = vld [vmem:[%s964_s0 + $0x160] sm:$0xff]  ;;  %v59_v19 = vld [vmem:[%s964_s0 + $0x158] sm:$0xff]  ;;  %v58_v23 = vld [vmem:[%s964_s0 + $0x150] sm:$0xff] }
   0x9   :  { %596 = vmatpush3.xpose.msk.msra.mxu1 %vm83_vm0, %v62_v7  ;;  %563 = vmatprep.subr.msk.mxu0 %vm83_vm0, %v45_v8  ;;  %v41_v24 = vld [vmem:[%s964_s0 + $0xc8] sm:$0xff]  ;;  %v792_v26 = vld [vmem:[%s965_s1] sm:$0x1] }
   0xa   :  { %597 = vmatprep.subr.msk.mxu1 %vm83_vm0, %v77_v9  ;;  %v73_v25 = vld [vmem:[%s964_s0 + $0x1c8] sm:$0xff] }
   0xc   :  { %564 = vmatpush3.xpose.msk.msra.mxu0 %vm83_vm0, %v29_v10 }
   0xd   :  { %598 = vmatpush3.xpose.msk.msra.mxu1 %vm83_vm0, %v61_v11  ;;  %565 = vmatprep.subr.msk.mxu0 %vm83_vm0, %v44_v12 }
   0xe   :  { %599 = vmatprep.subr.msk.mxu1 %vm83_vm0, %v76_v13 }
  0x10   :  { %566 = vmatpush3.xpose.msk.msra.mxu0 %vm83_vm0, %v28_v14 }
  0x11   :  { %600 = vmatpush3.xpose.msk.msra.mxu1 %vm83_vm0, %v60_v15  ;;  %567 = vmatprep.subr.msk.mxu0 %vm83_vm0, %v43_v16 }
  0x12   :  { %601 = vmatprep.subr.msk.mxu1 %vm83_vm0, %v75_v17 }
  0x14   :  { %568 = vmatpush3.xpose.msk.msra.mxu0 %vm83_vm0, %v27_v18 }
  0x15   :  { %602 = vmatpush3.xpose.msk.msra.mxu1 %vm83_vm0, %v59_v19  ;;  %569 = vmatprep.subr.msk.mxu0 %vm83_vm0, %v42_v20 }
  0x16   :  { %603 = vmatprep.subr.msk.mxu1 %vm83_vm0, %v74_v21 }
  0x17   :  { %9 = vsyncpa [#allocation4], 0  ;;  %v25_v27 = vld [vmem:[%s964_s0 + $0x48] sm:$0xff]  ;;  %v40_v29 = vld [vmem:[%s964_s0 + $0xc0] sm:$0xff]  ;;  %591 = vmatprep.mubr.msk.f32.mxu0 %vm83_vm0, %v792_v26  ;;  %625 = vmatprep.mubr.msk.f32.mxu1 %vm83_vm0, %v792_v26  ;;  %v82_v1 = vstv %s966_s2 }
  0x18   :  { %570 = vmatpush3.xpose.msk.msra.mxu0 %vm83_vm0, %v26_v22  ;;  %v57_v28 = vld [vmem:[%s964_s0 + $0x148] sm:$0xff]  ;;  %v72_v30 = vld [vmem:[%s964_s0 + $0x1c0] sm:$0xff]  ;;  %v39_v33 = vld [vmem:[%s964_s0 + $0xb8] sm:$0xff] }
  0x19   :  { %604 = vmatpush3.xpose.msk.msra.mxu1 %vm83_vm0, %v58_v23  ;;  %571 = vmatprep.subr.msk.mxu0 %vm83_vm0, %v41_v24  ;;  %v24_v31 = vld [vmem:[%s964_s0 + $0x40] sm:$0xff]  ;;  %v71_v34 = vld [vmem:[%s964_s0 + $0x1b8] sm:$0xff]  ;;  %v38_v37 = vld [vmem:[%s964_s0 + $0xb0] sm:$0xff] }
  0x1a   :  { %605 = vmatprep.subr.msk.mxu1 %vm83_vm0, %v73_v25  ;;  %v56_v32 = vld [vmem:[%s964_s0 + $0x140] sm:$0xff]  ;;  %v23_v35 = vld [vmem:[%s964_s0 + $0x38] sm:$0xff]  ;;  %v70_v38 = vld [vmem:[%s964_s0 + $0x1b0] sm:$0xff] }
  0x1b   :  { %v55_v36 = vld [vmem:[%s964_s0 + $0x138] sm:$0xff]  ;;  %v22_v39 = vld [vmem:[%s964_s0 + $0x30] sm:$0xff]  ;;  %v37_v41 = vld [vmem:[%s964_s0 + $0xa8] sm:$0xff] }
  0x1c   :  { %572 = vmatpush3.xpose.msk.msra.mxu0 %vm83_vm0, %v25_v27  ;;  %v54_v40 = vld [vmem:[%s964_s0 + $0x130] sm:$0xff]  ;;  %v69_v42 = vld [vmem:[%s964_s0 + $0x1a8] sm:$0xff]  ;;  %v36_v45 = vld [vmem:[%s964_s0 + $0xa0] sm:$0xff] }
  0x1d   :  { %606 = vmatpush3.xpose.msk.msra.mxu1 %vm83_vm0, %v57_v28  ;;  %573 = vmatprep.subr.msk.mxu0 %vm83_vm0, %v40_v29  ;;  %v21_v43 = vld [vmem:[%s964_s0 + $0x28] sm:$0xff]  ;;  %v68_v46 = vld [vmem:[%s964_s0 + $0x1a0] sm:$0xff]  ;;  %v35_v49 = vld [vmem:[%s964_s0 + $0x98] sm:$0xff]  ;;  %v454_v28 = vlaneseq }
  0x1e   :  { %607 = vmatprep.subr.msk.mxu1 %vm83_vm0, %v72_v30  ;;  %v53_v44 = vld [vmem:[%s964_s0 + $0x128] sm:$0xff]  ;;  %v20_v47 = vld [vmem:[%s964_s0 + $0x20] sm:$0xff]  ;;  %v67_v50 = vld [vmem:[%s964_s0 + $0x198] sm:$0xff] }
  0x1f   :  { %v52_v48 = vld [vmem:[%s964_s0 + $0x120] sm:$0xff]  ;;  %v19_v51 = vld [vmem:[%s964_s0 + $0x18] sm:$0xff]  ;;  %v34_v53 = vld [vmem:[%s964_s0 + $0x90] sm:$0xff]  ;;  %v455_v30 = vshrl.u32 %v454_v28, 7  ;;  %vm476_vm1 = vcmp.lt.s32.totalorder %v454_v28, 512 }
  0x20   :  { %574 = vmatpush3.xpose.msk.msra.mxu0 %vm83_vm0, %v24_v31  ;;  %v51_v52 = vld [vmem:[%s964_s0 + $0x118] sm:$0xff]  ;;  %v66_v54 = vld [vmem:[%s964_s0 + $0x190] sm:$0xff]  ;;  %v33_v57 = vld [vmem:[%s964_s0 + $0x88] sm:$0xff] }
  0x21   :  { %608 = vmatpush3.xpose.msk.msra.mxu1 %vm83_vm0, %v56_v32  ;;  %575 = vmatprep.subr.msk.mxu0 %vm83_vm0, %v39_v33  ;;  %v18_v55 = vld [vmem:[%s964_s0 + $0x10] sm:$0xff]  ;;  %v65_v58 = vld [vmem:[%s964_s0 + $0x188] sm:$0xff]  ;;  %v32_v61 = vld [vmem:[%s964_s0 + $0x80] sm:$0xff] }
  0x22   :  { %609 = vmatprep.subr.msk.mxu1 %vm83_vm0, %v71_v34  ;;  %v50_v56 = vld [vmem:[%s964_s0 + $0x110] sm:$0xff]  ;;  %v17_v59 = vld [vmem:[%s964_s0 + $0x8] sm:$0xff]  ;;  %v64_v62 = vld [vmem:[%s964_s0 + $0x180] sm:$0xff] }
  0x23   :  { %v49_v60 = vld [vmem:[%s964_s0 + $0x108] sm:$0xff]  ;;  %v16_v63 = vld [vmem:[%s964_s0] sm:$0xff] }
  0x24   :  { %576 = vmatpush3.xpose.msk.msra.mxu0 %vm83_vm0, %v23_v35  ;;  %v48_v0 = vld [vmem:[%s964_s0 + $0x100] sm:$0xff]  ;;  %s668_s0 = smov [#allocation3]  }
  0x25   :  { %610 = vmatpush3.xpose.msk.msra.mxu1 %vm83_vm0, %v55_v36  ;;  %577 = vmatprep.subr.msk.mxu0 %vm83_vm0, %v38_v37  ;;  %s485_s2 = sshll.u32 %s668_s0, 4  ;;  %s486_s2 = int_to_ptr.vmem [resolvable:$true] %s485_s2 }
  0x26   :  { %611 = vmatprep.subr.msk.mxu1 %vm83_vm0, %v70_v38  ;;  %s645_s6 = scalar_lea.vmem %s486_s2, 64  ;;  %p650_p1 = scmp.lt.s32.totalorder %s486_s2, %s486_s2 }
  0x27   :  { %p646_p0 = scmp.ne.s32.totalorder %s486_s2, %s645_s6  ;;  %p651_p2 = scmp.lt.s32.totalorder %s645_s6, %s645_s6 }
  0x28   :  { %578 = vmatpush3.xpose.msk.msra.mxu0 %vm83_vm0, %v22_v39 }
  0x29   :  { %612 = vmatpush3.xpose.msk.msra.mxu1 %vm83_vm0, %v54_v40  ;;  %579 = vmatprep.subr.msk.mxu0 %vm83_vm0, %v37_v41  ;;  %p652_p3 = por %p651_p2, %p650_p1 }
  0x2a   :  { %613 = vmatprep.subr.msk.mxu1 %vm83_vm0, %v69_v42 }
  0x2b   :  { %p653_p4 = pnand %p652_p3, %p646_p0 }
  0x2c   :  { %580 = vmatpush3.xpose.msk.msra.mxu0 %vm83_vm0, %v21_v43 }
  0x2d   :  { %614 = vmatpush3.xpose.msk.msra.mxu1 %vm83_vm0, %v53_v44  ;;  %581 = vmatprep.subr.msk.mxu0 %vm83_vm0, %v36_v45 }
  0x2e   :  { %615 = vmatprep.subr.msk.mxu1 %vm83_vm0, %v68_v46 }
  0x30   :  { %582 = vmatpush3.xpose.msk.msra.mxu0 %vm83_vm0, %v20_v47 }
  0x31   :  { %616 = vmatpush3.xpose.msk.msra.mxu1 %vm83_vm0, %v52_v48  ;;  %583 = vmatprep.subr.msk.mxu0 %vm83_vm0, %v35_v49 }
  0x32   :  { %617 = vmatprep.subr.msk.mxu1 %vm83_vm0, %v67_v50 }
  0x34   :  { %584 = vmatpush3.xpose.msk.msra.mxu0 %vm83_vm0, %v19_v51 }
  0x35   :  { %618 = vmatpush3.xpose.msk.msra.mxu1 %vm83_vm0, %v51_v52  ;;  %585 = vmatprep.subr.msk.mxu0 %vm83_vm0, %v34_v53 }
  0x36   :  { %619 = vmatprep.subr.msk.mxu1 %vm83_vm0, %v66_v54 }
  0x38   :  { %586 = vmatpush3.xpose.msk.msra.mxu0 %vm83_vm0, %v18_v55 }
  0x39   :  { %620 = vmatpush3.xpose.msk.msra.mxu1 %vm83_vm0, %v50_v56  ;;  %587 = vmatprep.subr.msk.mxu0 %vm83_vm0, %v33_v57 }
  0x3a   :  { %621 = vmatprep.subr.msk.mxu1 %vm83_vm0, %v65_v58 }
  0x3c   :  { %588 = vmatpush3.xpose.msk.msra.mxu0 %vm83_vm0, %v17_v59 }
  0x3d   :  { %622 = vmatpush3.xpose.msk.msra.mxu1 %vm83_vm0, %v49_v60  ;;  %589 = vmatprep.subr.msk.mxu0 %vm83_vm0, %v32_v61 }
  0x3e   :  { %623 = vmatprep.subr.msk.mxu1 %vm83_vm0, %v64_v62 }
  0x40   :  { %590 = vmatpush3.xpose.msk.msra.mxu0 %vm83_vm0, %v16_v63 }
  0x41   :  { %624 = vmatpush3.xpose.msk.msra.mxu1 %vm83_vm0, %v48_v0 }
  0x43   :  { %592 = vmatmul.mubr.msk.f32.vlgmr.msra.gmra.mxu0 %vm83_vm0, %v792_v26 }
  0x44   :  { %626 = vmatmul.mubr.msk.f32.vlgmr.msra.gmra.mxu1 %vm83_vm0, %v792_v26  ;;  %v667_v26 = vmov 1966171168  }
  0x45   :  { %v452_v27 = vunpack.c.l.s4 %v667_v26 }
  0x47   :  { %v453_v29 = vunpack.c.0.s8 %v452_v27 }
  0x49   :  { %v456_v33 = vsub.s32 %v453_v29, %v455_v30 }
 0x103   :  { %v345_v2 = vpop.f32.mrf.mxu0 }
 0x104   :  { %v416_v3 = vpop.f32.mrf.mxu1  ;;  %v346_v4 = vadd.f32 %v345_v2, %v82_v1 }
 0x105   :  { %v417_v5 = vadd.f32 %v416_v3, %v82_v1  ;;  %v347_v6 = vpop.f32.mrf.mxu0 }
 0x106   :  { %v418_v7 = vpop.f32.mrf.mxu1  ;;  %v421_v8 = vsub.f32 0.0, %v346_v4  ;;  %v348_v10 = vadd.f32 %v347_v6, %v82_v1 }
 0x107   :  { %v423_v9 = vsub.f32 0.0, %v417_v5  ;;  %v419_v11 = vadd.f32 %v418_v7, %v82_v1 }
 0x108   :  { %v425_v12 = vmul.f32 1.442695, %v421_v8  ;;  %v422_v14 = vsub.f32 0.0, %v348_v10 }
 0x109   :  { %v429_v13 = vmul.f32 1.442695, %v423_v9  ;;  %v424_v15 = vsub.f32 0.0, %v419_v11 }
 0x10a   :  { %629 = vpow2.f32 %v425_v12  ;;  %v427_v16 = vmul.f32 1.442695, %v422_v14 }
 0x10b   :  { %v431_v17 = vmul.f32 1.442695, %v424_v15  ;;  %631 = vpow2.f32 %v429_v13 }
 0x10c   :  { %633 = vpow2.f32 %v427_v16 }
 0x10d   :  { %635 = vpow2.f32 %v431_v17 }
 0x117   :  { %v630_v18 = vpop.eup %629 }
 0x118   :  { %v632_v19 = vpop.eup %631  ;;  %v433_v20 = vadd.f32 1.0, %v630_v18 }
 0x119   :  { %v634_v21 = vpop.eup %633  ;;  %v435_v22 = vadd.f32 1.0, %v632_v19 }
 0x11a   :  { %v636_v23 = vpop.eup %635  ;;  %637 = vrcp.f32 %v433_v20  ;;  %v434_v24 = vadd.f32 1.0, %v634_v21 }
 0x11b   :  { %639 = vrcp.f32 %v435_v22  ;;  %v436_v25 = vadd.f32 1.0, %v636_v23 }
 0x11c   :  { %641 = vrcp.f32 %v434_v24 }
 0x11d   :  { %643 = vrcp.f32 %v436_v25 }
 0x127   :  { %v638_v31 = vpop.eup %637 }
 0x128   :  { %v640_v32 = vpop.eup %639 }
 0x129   :  { %v642_v34 = vpop.eup %641 }
 0x12a   :  { %v644_v35 = vpop.eup %643  ;;  %v449_v36 = vcombine.low %v638_v31, %v642_v34 }
 0x12b   :  { %v450_v37 = vcombine.low %v640_v32, %v644_v35 }
 0x12c   :  { %v457_v38 = vrot.slane %v449_v36, %v456_v33 }
 0x12d   :  { %v464_v39 = vrot.slane %v450_v37, %v456_v33 }
 0x12f   :  { %v465_v40 = vcombine.low %v457_v38, %v464_v39 }
 0x131   :  { %v472_v41 = vrot.slane %v465_v40, %v456_v33 }
 0x133   :  { %478 = vst.msk [vmem:[#allocation3] sm:$0xf] %vm476_vm1, %v472_v41 }
 0x134   :  { %656 = shalt.err (!%p653_p4)
}
 0x135   :  { %488 = dma.vmem_to_hbm [thread:$0]  %s486_s2, 64, %s967_s3, [#allocation4]  }
 0x136   :  { %665 = dma.done.wait [#allocation4], 64  }
 0x137   :  { %666 = vsyncadd [#allocation4], 4294967232 }
 0x138   :  { %492 = vsyncpa [#allocation4], 1 }

</bundles_post_ra>
